<compile_context>
chip_gen: v7x
topology: tpu7x:2x2x1
jax: 0.10.0
libtpu: 0.0.40
codegen_flags: <defaults>
</compile_context>

<pallas_src>
import jax
import jax.numpy as jnp
from jax.experimental import pallas as pl
from jax.experimental.pallas import tpu as pltpu

LANE = 128            # vreg lane width (last dim)
BATCH_ALIGN = 16      # bf16 sublane packing for in-kernel-casted activations
MAX_BATCH_TILE = 1024 # double-buffered tiles stay well inside v7x's 64 MiB VMEM


def _round_up(n, m):
    return ((n + m - 1) // m) * m


def _pad2d(arr, rows, cols):
    r, c = arr.shape
    if r == rows and c == cols:        # skip the extra HBM copy when aligned
        return arr
    return jnp.pad(arr, ((0, rows - r), (0, cols - c)))


# ---------------------------------------------------------------------------
# Fused encoder + decoder kernel (one batch tile per grid step).
# ---------------------------------------------------------------------------
def _vae_fused_kernel(x_ref, noise_ref,
                      ew1_ref, eb1_ref, ew2_ref, eb2_ref, ewh_ref, ebh_ref,
                      dw1_ref, db1_ref, dw2_ref, db2_ref, dw3_ref, db3_ref,
                      px_ref, heads_ref):
    bf16 = jnp.bfloat16
    f32 = jnp.float32

    # ---- Encoder: [Linear -> ReLU] x 2 -> fused (mu | logvar) head ----
    h = jnp.dot(x_ref[...].astype(bf16), ew1_ref[...],
                preferred_element_type=f32) + eb1_ref[...]
    h = jnp.maximum(h, 0.0)
    h = jnp.dot(h.astype(bf16), ew2_ref[...],
                preferred_element_type=f32) + eb2_ref[...]
    h = jnp.maximum(h, 0.0)
    heads_ref[...] = jnp.dot(h.astype(bf16), ewh_ref[...],
                             preferred_element_type=f32) + ebh_ref[...]

    # ---- Decoder on fresh Gaussian noise: [Linear -> ReLU] x 2 -> Linear -> Sigmoid ----
    g = jnp.dot(noise_ref[...].astype(bf16), dw1_ref[...],
                preferred_element_type=f32) + db1_ref[...]
    g = jnp.maximum(g, 0.0)
    g = jnp.dot(g.astype(bf16), dw2_ref[...],
                preferred_element_type=f32) + db2_ref[...]
    g = jnp.maximum(g, 0.0)
    g = jnp.dot(g.astype(bf16), dw3_ref[...],
                preferred_element_type=f32) + db3_ref[...]
    px_ref[...] = jax.nn.sigmoid(g)


# ---------------------------------------------------------------------------
# One-time parameter preparation (padding + bf16 cast, hoisted out of forward).
# ---------------------------------------------------------------------------
def prepare_vae_params(enc_params, dec_params):
    """enc_params = (w1, b1, w2, b2, wmu, bmu, wlv, blv);
    dec_params = (dw1, db1, dw2, db2, dw3, db3).
    Weights are (in, out); biases are (1, out)."""
    w1, b1, w2, b2, wmu, bmu, wlv, blv = enc_params
    dw1, db1, dw2, db2, dw3, db3 = dec_params

    data_size, e_h1 = w1.shape
    e_h2 = w2.shape[1]
    latent = wmu.shape[1]
    d_h1, d_h2 = dw1.shape[1], dw2.shape[1]
    assert dw3.shape[1] == data_size and dw1.shape[0] == latent

    data_p = _round_up(data_size, LANE)
    e_h1_p, e_h2_p = _round_up(e_h1, LANE), _round_up(e_h2, LANE)
    d_h1_p, d_h2_p = _round_up(d_h1, LANE), _round_up(d_h2, LANE)
    latent_p = _round_up(latent, LANE)
    heads_p = _round_up(2 * latent, LANE)

    bf16, f32 = jnp.bfloat16, jnp.float32

    # Concatenate mu / logvar heads: one matmul, one output writeback.
    wh = jnp.concatenate([wmu, wlv], axis=1)     # (e_h2, 2*latent)
    bh = jnp.concatenate([bmu, blv], axis=1)     # (1, 2*latent)

    padded = (
        _pad2d(w1, data_p, e_h1_p).astype(bf16),   _pad2d(b1, 1, e_h1_p).astype(f32),
        _pad2d(w2, e_h1_p, e_h2_p).astype(bf16),   _pad2d(b2, 1, e_h2_p).astype(f32),
        _pad2d(wh, e_h2_p, heads_p).astype(bf16),  _pad2d(bh, 1, heads_p).astype(f32),
        _pad2d(dw1, latent_p, d_h1_p).astype(bf16), _pad2d(db1, 1, d_h1_p).astype(f32),
        _pad2d(dw2, d_h1_p, d_h2_p).astype(bf16),   _pad2d(db2, 1, d_h2_p).astype(f32),
        _pad2d(dw3, d_h2_p, data_p).astype(bf16),   _pad2d(db3, 1, data_p).astype(f32),
    )
    dims = dict(data_size=data_size, latent=latent,
                data_p=data_p, latent_p=latent_p, heads_p=heads_p)
    return padded, dims


# ---------------------------------------------------------------------------
# Batch tiling (aligned to 16; guarantees >=2 grid steps when the batch allows
# it so v7x's two TensorCores both get work).
# ---------------------------------------------------------------------------
def _batch_tiling(batch, batch_tile=None):
    if batch_tile is None:
        batch_tile = min(MAX_BATCH_TILE, _round_up(batch, BATCH_ALIGN))
        if (batch_tile >= 2 * BATCH_ALIGN
                and _round_up(batch, batch_tile) == batch_tile):
            batch_tile = _round_up(batch_tile // 2, BATCH_ALIGN)
    batch_tile = _round_up(batch_tile, BATCH_ALIGN)
    batch_p = _round_up(batch, batch_tile)
    return batch_tile, batch_p


# ---------------------------------------------------------------------------
# Forward wrapper: single fused pallas_call.
# ---------------------------------------------------------------------------
def vae_forward(x, noise, prepared_params, dims, *, batch_tile=None):
    """VAE.forward: (p_x, mu, logvar). `noise` plays torch.randn_like(z)."""
    (ew1, eb1, ew2, eb2, ewh, ebh,
     dw1, db1, dw2, db2, dw3, db3) = prepared_params
    batch = x.shape[0]
    data_size, latent = dims["data_size"], dims["latent"]
    data_p, latent_p, heads_p = dims["data_p"], dims["latent_p"], dims["heads_p"]

    batch_tile, batch_p = _batch_tiling(batch, batch_tile)
    grid = (batch_p // batch_tile,)

    # Pad activations only if not already aligned.
    x_p = _pad2d(x, batch_p, data_p)
    noise_p = _pad2d(noise, batch_p, latent_p)

    def tile_spec(cols):
        return pl.BlockSpec((batch_tile, cols), lambda i: (i, 0))

    def resident_spec(arr):
        # Constant block index: weight/bias stays VMEM-resident across steps.
        return pl.BlockSpec(arr.shape, lambda i: (0, 0))

    weight_specs = [resident_spec(a) for a in prepared_params]

    # Cost estimate: fused GEMM flops, sigmoid transcendentals, HBM bytes
    # (resident weights counted once per call, matching the constant specs).
    e_h1_p, e_h2_p = ew1.shape[1], ew2.shape[1]
    d_h1_p, d_h2_p = dw1.shape[1], dw2.shape[1]
    flops = 2 * batch_p * (data_p * e_h1_p + e_h1_p * e_h2_p + e_h2_p * heads_p
                           + latent_p * d_h1_p + d_h1_p * d_h2_p
                           + d_h2_p * data_p)
    resident_bytes = sum(int(a.size) * a.dtype.itemsize for a in prepared_params)
    act_bytes = 4 * batch_p * (data_p + latent_p + data_p + heads_p)
    cost = pl.CostEstimate(flops=flops, transcendentals=batch_p * data_p,
                           bytes_accessed=resident_bytes + act_bytes)

    # Raise the scoped-VMEM limit only when a large tile actually needs it
    # (big-batch v5e/v6e case); cap at v7x's 64 MiB physical VMEM.
    tile_bytes = 4 * batch_tile * (data_p + latent_p + data_p + heads_p)
    vmem_need = 2 * tile_bytes + 2 * resident_bytes   # double-buffered
    compiler_kwargs = dict(dimension_semantics=("parallel",))
    if vmem_need > 24 * 1024 * 1024:
        compiler_kwargs["vmem_limit_bytes"] = min(
            _round_up(vmem_need + (8 << 20), 1 << 20), 64 * 1024 * 1024)

    p_x_p, heads = pl.pallas_call(
        _vae_fused_kernel,
        out_shape=(jax.ShapeDtypeStruct((batch_p, data_p), jnp.float32),
                   jax.ShapeDtypeStruct((batch_p, heads_p), jnp.float32)),
        grid=grid,
        in_specs=[tile_spec(data_p), tile_spec(latent_p)] + weight_specs,
        out_specs=(tile_spec(data_p), tile_spec(heads_p)),
        compiler_params=pltpu.CompilerParams(**compiler_kwargs),
        cost_estimate=cost,
    )(x_p, noise_p, *prepared_params)

    p_x = p_x_p[:batch, :data_size]
    mu = heads[:batch, :latent]
    logvar = heads[:batch, latent:2 * latent]
    return p_x, mu, logvar


# ---------------------------------------------------------------------------
# Synthetic parameter init + pure-JAX references (same bf16-dot math).
# ---------------------------------------------------------------------------
def _init_linear(key, fan_in, fan_out):
    kw, kb = jax.random.split(key)
    scale = 1.0 / float(fan_in) ** 0.5
    w = jax.random.uniform(kw, (fan_in, fan_out), jnp.float32, -scale, scale)
    b = jax.random.uniform(kb, (1, fan_out), jnp.float32, -scale, scale)
    return w, b


def init_encoder_params(key, data_size, hidden_sizes, latent_size):
    sizes = [data_size] + hidden_sizes
    params = []
    for fan_in, fan_out in zip(sizes[:-1], sizes[1:]):
        key, k = jax.random.split(key)
        params.extend(_init_linear(k, fan_in, fan_out))
    key, kmu, klv = jax.random.split(key, 3)
    params.extend(_init_linear(kmu, sizes[-1], latent_size))   # mu head
    params.extend(_init_linear(klv, sizes[-1], latent_size))   # logvar head
    return tuple(params)


def init_decoder_params(key, data_size, hidden_sizes, latent_size):
    sizes = [latent_size] + hidden_sizes + [data_size]
    params = []
    for fan_in, fan_out in zip(sizes[:-1], sizes[1:]):
        key, k = jax.random.split(key)
        params.extend(_init_linear(k, fan_in, fan_out))
    return tuple(params)


def _ref_linear(x, w, b):
    # Matches the kernel: bf16 operands, f32 accumulation, f32 bias add.
    return jnp.dot(x.astype(jnp.bfloat16), w.astype(jnp.bfloat16),
                   preferred_element_type=jnp.float32) + b


def vae_encoder_ref(x, params):
    w1, b1, w2, b2, wmu, bmu, wlv, blv = params
    h = jnp.maximum(_ref_linear(x, w1, b1), 0.0)
    h = jnp.maximum(_ref_linear(h, w2, b2), 0.0)
    return _ref_linear(h, wmu, bmu), _ref_linear(h, wlv, blv)


def vae_decoder_ref(z, params):
    w1, b1, w2, b2, w3, b3 = params
    h = jnp.maximum(_ref_linear(z, w1, b1), 0.0)
    h = jnp.maximum(_ref_linear(h, w2, b2), 0.0)
    return jax.nn.sigmoid(_ref_linear(h, w3, b3))


if __name__ == "__main__":
    # Small shapes consistent with the module:
    #   x: (batch, data_size); encoder_szs=[64, 32]; latent_size=16;
    #   decoder_szs = encoder_szs[::-1] = [32, 64]
    batch, data_size, encoder_szs, latent_size = 8, 128, [64, 32], 16
    decoder_szs = encoder_szs[::-1]

    key = jax.random.PRNGKey(0)
    key, kx, knoise, kenc, kdec = jax.random.split(key, 5)
    x = jax.random.normal(kx, (batch, data_size), jnp.float32)
    # torch.randn_like(z) equivalent (z only contributes its shape).
    noise = jax.random.normal(knoise, (batch, latent_size), jnp.float32)

    enc_params = init_encoder_params(kenc, data_size, encoder_szs, latent_size)
    dec_params = init_decoder_params(kdec, data_size, decoder_szs, latent_size)

    # One-time (hoisted) padding + bf16 casting of the parameters.
    prepared, dims = prepare_vae_params(enc_params, dec_params)

    p_x, mu, logvar = vae_forward(x, noise, prepared, dims)
    p_x = jax.block_until_ready(p_x)
    mu = jax.block_until_ready(mu)
    logvar = jax.block_until_ready(logvar)

    mu_ref, logvar_ref = vae_encoder_ref(x, enc_params)
    p_x_ref = vae_decoder_ref(noise, dec_params)

    assert p_x.shape == (batch, data_size)
    assert mu.shape == (batch, latent_size)
    assert logvar.shape == (batch, latent_size)
    # bf16 matmul operands -> compare against a bf16-dot reference with a
    # modest tolerance (sigmoid approximation may differ slightly in-kernel).
    assert jnp.allclose(p_x, p_x_ref, atol=2e-3, rtol=2e-3), "p_x mismatch"
    assert jnp.allclose(mu, mu_ref, atol=2e-3, rtol=2e-3), "mu mismatch"
    assert jnp.allclose(logvar, logvar_ref, atol=2e-3, rtol=2e-3), "logvar mismatch"

    print("KERNEL_OK")
</pallas_src>

<mosaic_0001>
module attributes {stable_mosaic.version = 11 : i64} {
  func.func @_vae_fused_kernel(%arg0: i32, %arg1: memref<16x128xf32, #tpu.memory_space<vmem>>, %arg2: memref<16x128xf32, #tpu.memory_space<vmem>>, %arg3: memref<128x128xbf16, #tpu.memory_space<vmem>>, %arg4: memref<1x128xf32, #tpu.memory_space<vmem>>, %arg5: memref<128x128xbf16, #tpu.memory_space<vmem>>, %arg6: memref<1x128xf32, #tpu.memory_space<vmem>>, %arg7: memref<128x128xbf16, #tpu.memory_space<vmem>>, %arg8: memref<1x128xf32, #tpu.memory_space<vmem>>, %arg9: memref<128x128xbf16, #tpu.memory_space<vmem>>, %arg10: memref<1x128xf32, #tpu.memory_space<vmem>>, %arg11: memref<128x128xbf16, #tpu.memory_space<vmem>>, %arg12: memref<1x128xf32, #tpu.memory_space<vmem>>, %arg13: memref<128x128xbf16, #tpu.memory_space<vmem>>, %arg14: memref<1x128xf32, #tpu.memory_space<vmem>>, %arg15: memref<16x128xf32, #tpu.memory_space<vmem>>, %arg16: memref<16x128xf32, #tpu.memory_space<vmem>>) attributes {dimension_semantics = [#tpu.dimension_semantics<parallel>], iteration_bounds = array<i64: 1>, scalar_prefetch = 0 : i64, scratch_operands = 0 : i64, tpu.core_type = #tpu.core_type<tc>, window_params = [{transform_indices = @transform_0, window_bounds = array<i64: 16, 128>}, {transform_indices = @transform_1, window_bounds = array<i64: 16, 128>}, {pipeline_mode = #tpu.pipeline_mode<synchronous>, transform_indices = @transform_2, window_bounds = array<i64: 128, 128>}, {pipeline_mode = #tpu.pipeline_mode<synchronous>, transform_indices = @transform_3, window_bounds = array<i64: 1, 128>}, {pipeline_mode = #tpu.pipeline_mode<synchronous>, transform_indices = @transform_4, window_bounds = array<i64: 128, 128>}, {pipeline_mode = #tpu.pipeline_mode<synchronous>, transform_indices = @transform_5, window_bounds = array<i64: 1, 128>}, {pipeline_mode = #tpu.pipeline_mode<synchronous>, transform_indices = @transform_6, window_bounds = array<i64: 128, 128>}, {pipeline_mode = #tpu.pipeline_mode<synchronous>, transform_indices = @transform_7, window_bounds = array<i64: 1, 128>}, {pipeline_mode = #tpu.pipeline_mode<synchronous>, transform_indices = @transform_8, window_bounds = array<i64: 128, 128>}, {pipeline_mode = #tpu.pipeline_mode<synchronous>, transform_indices = @transform_9, window_bounds = array<i64: 1, 128>}, {pipeline_mode = #tpu.pipeline_mode<synchronous>, transform_indices = @transform_10, window_bounds = array<i64: 128, 128>}, {pipeline_mode = #tpu.pipeline_mode<synchronous>, transform_indices = @transform_11, window_bounds = array<i64: 1, 128>}, {pipeline_mode = #tpu.pipeline_mode<synchronous>, transform_indices = @transform_12, window_bounds = array<i64: 128, 128>}, {pipeline_mode = #tpu.pipeline_mode<synchronous>, transform_indices = @transform_13, window_bounds = array<i64: 1, 128>}, {transform_indices = @transform_14, window_bounds = array<i64: 16, 128>}, {transform_indices = @transform_15, window_bounds = array<i64: 16, 128>}]} {
    %c0 = arith.constant 0 : index
    %c0_0 = arith.constant 0 : index
    %0 = vector.load %arg1[%c0, %c0_0] : memref<16x128xf32, #tpu.memory_space<vmem>>, vector<16x128xf32>
    %1 = arith.truncf %0 : vector<16x128xf32> to vector<16x128xbf16>
    %c0_1 = arith.constant 0 : index
    %c0_2 = arith.constant 0 : index
    %2 = vector.load %arg3[%c0_1, %c0_2] : memref<128x128xbf16, #tpu.memory_space<vmem>>, vector<128x128xbf16>
    %cst = arith.constant dense<0.000000e+00> : vector<16x128xf32>
    %3 = tpu.matmul %1, %2, %cst {dimension_numbers = #tpu.dot_dimension_numbers<[1], [0], [0], [1], [0, 0, 1, 1], [], []>} : vector<16x128xbf16>, vector<128x128xbf16>, vector<16x128xf32> -> vector<16x128xf32>
    %c0_3 = arith.constant 0 : index
    %c0_4 = arith.constant 0 : index
    %4 = vector.load %arg4[%c0_3, %c0_4] : memref<1x128xf32, #tpu.memory_space<vmem>>, vector<1x128xf32>
    %5 = vector.broadcast %4 : vector<1x128xf32> to vector<16x128xf32>
    %6 = arith.addf %3, %5 : vector<16x128xf32>
    %cst_5 = arith.constant 0.000000e+00 : f32
    %7 = vector.broadcast %cst_5 : f32 to vector<16x128xf32>
    %8 = arith.maximumf %6, %7 : vector<16x128xf32>
    %9 = arith.truncf %8 : vector<16x128xf32> to vector<16x128xbf16>
    %c0_6 = arith.constant 0 : index
    %c0_7 = arith.constant 0 : index
    %10 = vector.load %arg5[%c0_6, %c0_7] : memref<128x128xbf16, #tpu.memory_space<vmem>>, vector<128x128xbf16>
    %cst_8 = arith.constant dense<0.000000e+00> : vector<16x128xf32>
    %11 = tpu.matmul %9, %10, %cst_8 {dimension_numbers = #tpu.dot_dimension_numbers<[1], [0], [0], [1], [0, 0, 1, 1], [], []>} : vector<16x128xbf16>, vector<128x128xbf16>, vector<16x128xf32> -> vector<16x128xf32>
    %c0_9 = arith.constant 0 : index
    %c0_10 = arith.constant 0 : index
    %12 = vector.load %arg6[%c0_9, %c0_10] : memref<1x128xf32, #tpu.memory_space<vmem>>, vector<1x128xf32>
    %13 = vector.broadcast %12 : vector<1x128xf32> to vector<16x128xf32>
    %14 = arith.addf %11, %13 : vector<16x128xf32>
    %cst_11 = arith.constant 0.000000e+00 : f32
    %15 = vector.broadcast %cst_11 : f32 to vector<16x128xf32>
    %16 = arith.maximumf %14, %15 : vector<16x128xf32>
    %17 = arith.truncf %16 : vector<16x128xf32> to vector<16x128xbf16>
    %c0_12 = arith.constant 0 : index
    %c0_13 = arith.constant 0 : index
    %18 = vector.load %arg7[%c0_12, %c0_13] : memref<128x128xbf16, #tpu.memory_space<vmem>>, vector<128x128xbf16>
    %cst_14 = arith.constant dense<0.000000e+00> : vector<16x128xf32>
    %19 = tpu.matmul %17, %18, %cst_14 {dimension_numbers = #tpu.dot_dimension_numbers<[1], [0], [0], [1], [0, 0, 1, 1], [], []>} : vector<16x128xbf16>, vector<128x128xbf16>, vector<16x128xf32> -> vector<16x128xf32>
    %c0_15 = arith.constant 0 : index
    %c0_16 = arith.constant 0 : index
    %20 = vector.load %arg8[%c0_15, %c0_16] : memref<1x128xf32, #tpu.memory_space<vmem>>, vector<1x128xf32>
    %21 = vector.broadcast %20 : vector<1x128xf32> to vector<16x128xf32>
    %22 = arith.addf %19, %21 : vector<16x128xf32>
    %c0_17 = arith.constant 0 : index
    %c0_18 = arith.constant 0 : index
    %23 = vector.load %arg16[%c0_17, %c0_18] : memref<16x128xf32, #tpu.memory_space<vmem>>, vector<16x128xf32>
    tpu.vector_store %arg16[%c0_17, %c0_18], %22 {strides = array<i32>} : memref<16x128xf32, #tpu.memory_space<vmem>>, vector<16x128xf32>,
    %c0_19 = arith.constant 0 : index
    %c0_20 = arith.constant 0 : index
    %24 = vector.load %arg2[%c0_19, %c0_20] : memref<16x128xf32, #tpu.memory_space<vmem>>, vector<16x128xf32>
    %25 = arith.truncf %24 : vector<16x128xf32> to vector<16x128xbf16>
    %c0_21 = arith.constant 0 : index
    %c0_22 = arith.constant 0 : index
    %26 = vector.load %arg9[%c0_21, %c0_22] : memref<128x128xbf16, #tpu.memory_space<vmem>>, vector<128x128xbf16>
    %cst_23 = arith.constant dense<0.000000e+00> : vector<16x128xf32>
    %27 = tpu.matmul %25, %26, %cst_23 {dimension_numbers = #tpu.dot_dimension_numbers<[1], [0], [0], [1], [0, 0, 1, 1], [], []>} : vector<16x128xbf16>, vector<128x128xbf16>, vector<16x128xf32> -> vector<16x128xf32>
    %c0_24 = arith.constant 0 : index
    %c0_25 = arith.constant 0 : index
    %28 = vector.load %arg10[%c0_24, %c0_25] : memref<1x128xf32, #tpu.memory_space<vmem>>, vector<1x128xf32>
    %29 = vector.broadcast %28 : vector<1x128xf32> to vector<16x128xf32>
    %30 = arith.addf %27, %29 : vector<16x128xf32>
    %cst_26 = arith.constant 0.000000e+00 : f32
    %31 = vector.broadcast %cst_26 : f32 to vector<16x128xf32>
    %32 = arith.maximumf %30, %31 : vector<16x128xf32>
    %33 = arith.truncf %32 : vector<16x128xf32> to vector<16x128xbf16>
    %c0_27 = arith.constant 0 : index
    %c0_28 = arith.constant 0 : index
    %34 = vector.load %arg11[%c0_27, %c0_28] : memref<128x128xbf16, #tpu.memory_space<vmem>>, vector<128x128xbf16>
    %cst_29 = arith.constant dense<0.000000e+00> : vector<16x128xf32>
    %35 = tpu.matmul %33, %34, %cst_29 {dimension_numbers = #tpu.dot_dimension_numbers<[1], [0], [0], [1], [0, 0, 1, 1], [], []>} : vector<16x128xbf16>, vector<128x128xbf16>, vector<16x128xf32> -> vector<16x128xf32>
    %c0_30 = arith.constant 0 : index
    %c0_31 = arith.constant 0 : index
    %36 = vector.load %arg12[%c0_30, %c0_31] : memref<1x128xf32, #tpu.memory_space<vmem>>, vector<1x128xf32>
    %37 = vector.broadcast %36 : vector<1x128xf32> to vector<16x128xf32>
    %38 = arith.addf %35, %37 : vector<16x128xf32>
    %cst_32 = arith.constant 0.000000e+00 : f32
    %39 = vector.broadcast %cst_32 : f32 to vector<16x128xf32>
    %40 = arith.maximumf %38, %39 : vector<16x128xf32>
    %41 = arith.truncf %40 : vector<16x128xf32> to vector<16x128xbf16>
    %c0_33 = arith.constant 0 : index
    %c0_34 = arith.constant 0 : index
    %42 = vector.load %arg13[%c0_33, %c0_34] : memref<128x128xbf16, #tpu.memory_space<vmem>>, vector<128x128xbf16>
    %cst_35 = arith.constant dense<0.000000e+00> : vector<16x128xf32>
    %43 = tpu.matmul %41, %42, %cst_35 {dimension_numbers = #tpu.dot_dimension_numbers<[1], [0], [0], [1], [0, 0, 1, 1], [], []>} : vector<16x128xbf16>, vector<128x128xbf16>, vector<16x128xf32> -> vector<16x128xf32>
    %c0_36 = arith.constant 0 : index
    %c0_37 = arith.constant 0 : index
    %44 = vector.load %arg14[%c0_36, %c0_37] : memref<1x128xf32, #tpu.memory_space<vmem>>, vector<1x128xf32>
    %45 = vector.broadcast %44 : vector<1x128xf32> to vector<16x128xf32>
    %46 = arith.addf %43, %45 : vector<16x128xf32>
    %47 = arith.negf %46 : vector<16x128xf32>
    %48 = math.exp %47 : vector<16x128xf32>
    %cst_38 = arith.constant 1.000000e+00 : f32
    %49 = vector.broadcast %cst_38 : f32 to vector<16x128xf32>
    %50 = arith.addf %49, %48 : vector<16x128xf32>
    %51 = arith.divf %49, %50 : vector<16x128xf32>
    %c0_39 = arith.constant 0 : index
    %c0_40 = arith.constant 0 : index
    %52 = vector.load %arg15[%c0_39, %c0_40] : memref<16x128xf32, #tpu.memory_space<vmem>>, vector<16x128xf32>
    tpu.vector_store %arg15[%c0_39, %c0_40], %51 {strides = array<i32>} : memref<16x128xf32, #tpu.memory_space<vmem>>, vector<16x128xf32>,
    return
  }
  func.func @transform_0(%arg0: i32) -> (i32, i32) {
    %c0_i32 = arith.constant 0 : i32
    %c0_i32_0 = arith.constant 0 : i32
    return %arg0, %c0_i32 : i32, i32
  }
  func.func @transform_1(%arg0: i32) -> (i32, i32) {
    %c0_i32 = arith.constant 0 : i32
    %c0_i32_0 = arith.constant 0 : i32
    return %arg0, %c0_i32 : i32, i32
  }
  func.func @transform_2(%arg0: i32) -> (i32, i32) {
    %c0_i32 = arith.constant 0 : i32
    %c0_i32_0 = arith.constant 0 : i32
    %c0_i32_1 = arith.constant 0 : i32
    return %c0_i32, %c0_i32_0 : i32, i32
  }
  func.func @transform_3(%arg0: i32) -> (i32, i32) {
    %c0_i32 = arith.constant 0 : i32
    %c0_i32_0 = arith.constant 0 : i32
    %c0_i32_1 = arith.constant 0 : i32
    return %c0_i32, %c0_i32_0 : i32, i32
  }
  func.func @transform_4(%arg0: i32) -> (i32, i32) {
    %c0_i32 = arith.constant 0 : i32
    %c0_i32_0 = arith.constant 0 : i32
    %c0_i32_1 = arith.constant 0 : i32
    return %c0_i32, %c0_i32_0 : i32, i32
  }
  func.func @transform_5(%arg0: i32) -> (i32, i32) {
    %c0_i32 = arith.constant 0 : i32
    %c0_i32_0 = arith.constant 0 : i32
    %c0_i32_1 = arith.constant 0 : i32
    return %c0_i32, %c0_i32_0 : i32, i32
  }
  func.func @transform_6(%arg0: i32) -> (i32, i32) {
    %c0_i32 = arith.constant 0 : i32
    %c0_i32_0 = arith.constant 0 : i32
    %c0_i32_1 = arith.constant 0 : i32
    return %c0_i32, %c0_i32_0 : i32, i32
  }
  func.func @transform_7(%arg0: i32) -> (i32, i32) {
    %c0_i32 = arith.constant 0 : i32
    %c0_i32_0 = arith.constant 0 : i32
    %c0_i32_1 = arith.constant 0 : i32
    return %c0_i32, %c0_i32_0 : i32, i32
  }
  func.func @transform_8(%arg0: i32) -> (i32, i32) {
    %c0_i32 = arith.constant 0 : i32
    %c0_i32_0 = arith.constant 0 : i32
    %c0_i32_1 = arith.constant 0 : i32
    return %c0_i32, %c0_i32_0 : i32, i32
  }
  func.func @transform_9(%arg0: i32) -> (i32, i32) {
    %c0_i32 = arith.constant 0 : i32
    %c0_i32_0 = arith.constant 0 : i32
    %c0_i32_1 = arith.constant 0 : i32
    return %c0_i32, %c0_i32_0 : i32, i32
  }
  func.func @transform_10(%arg0: i32) -> (i32, i32) {
    %c0_i32 = arith.constant 0 : i32
    %c0_i32_0 = arith.constant 0 : i32
    %c0_i32_1 = arith.constant 0 : i32
    return %c0_i32, %c0_i32_0 : i32, i32
  }
  func.func @transform_11(%arg0: i32) -> (i32, i32) {
    %c0_i32 = arith.constant 0 : i32
    %c0_i32_0 = arith.constant 0 : i32
    %c0_i32_1 = arith.constant 0 : i32
    return %c0_i32, %c0_i32_0 : i32, i32
  }
  func.func @transform_12(%arg0: i32) -> (i32, i32) {
    %c0_i32 = arith.constant 0 : i32
    %c0_i32_0 = arith.constant 0 : i32
    %c0_i32_1 = arith.constant 0 : i32
    return %c0_i32, %c0_i32_0 : i32, i32
  }
  func.func @transform_13(%arg0: i32) -> (i32, i32) {
    %c0_i32 = arith.constant 0 : i32
    %c0_i32_0 = arith.constant 0 : i32
    %c0_i32_1 = arith.constant 0 : i32
    return %c0_i32, %c0_i32_0 : i32, i32
  }
  func.func @transform_14(%arg0: i32) -> (i32, i32) {
    %c0_i32 = arith.constant 0 : i32
    %c0_i32_0 = arith.constant 0 : i32
    return %arg0, %c0_i32 : i32, i32
  }
  func.func @transform_15(%arg0: i32) -> (i32, i32) {
    %c0_i32 = arith.constant 0 : i32
    %c0_i32_0 = arith.constant 0 : i32
    return %arg0, %c0_i32 : i32, i32
  }
}

</mosaic_0001>

<bundles_post_ra>
// kernel: tpu_custom_call.1
= control target key start
LH: loop header
LB: loop body
LE: loop exit
PB: predicated region body
PF: predicated region fallthrough
CT: control target
= control target key end

     0   :  { %s1764_s0 = inlined_call_operand.hbm [shape: f32[16,128], index: 0, kind: input, shape index: {}]   ;;  %s1765_s1 = inlined_call_operand.hbm [shape: f32[16,128], index: 1, kind: input, shape index: {}]   ;;  %s1766_s2 = inlined_call_operand.hbm [shape: bf16[128,128], index: 2, kind: input, shape index: {}]   ;;  %s1767_s3 = inlined_call_operand.vmem [shape: f32[1,128], index: 3, kind: input, shape index: {}]   ;;  %s1768_s4 = inlined_call_operand.hbm [shape: bf16[128,128], index: 4, kind: input, shape index: {}]   ;;  %s1769_s5 = inlined_call_operand.vmem [shape: f32[1,128], index: 5, kind: input, shape index: {}]   ;;  %s1770_s6 = inlined_call_operand.hbm [shape: bf16[128,128], index: 6, kind: input, shape index: {}]   ;;  %s1771_s7 = inlined_call_operand.vmem [shape: f32[1,128], index: 7, kind: input, shape index: {}]   ;;  %s1772_s8 = inlined_call_operand.hbm [shape: bf16[128,128], index: 8, kind: input, shape index: {}]   ;;  %s1773_s9 = inlined_call_operand.vmem [shape: f32[1,128], index: 9, kind: input, shape index: {}]   ;;  %s1774_s10 = inlined_call_operand.hbm [shape: bf16[128,128], index: 10, kind: input, shape index: {}]   ;;  %s1775_s11 = inlined_call_operand.vmem [shape: f32[1,128], index: 11, kind: input, shape index: {}]   ;;  %s1776_s12 = inlined_call_operand.hbm [shape: bf16[128,128], index: 12, kind: input, shape index: {}]   ;;  %s1777_s13 = inlined_call_operand.vmem [shape: f32[1,128], index: 13, kind: input, shape index: {}]   ;;  %s1778_s14 = inlined_call_operand.hbm [shape: f32[16,128], index: 14, kind: output, shape index: {0}]   ;;  %s1779_s15 = inlined_call_operand.hbm [shape: f32[16,128], index: 15, kind: output, shape index: {1}]  }
   0x1   :  { %1781 = sst [smem:[#allocation26_spill]] %s1778_s14 }
   0x2   :  { %21 = vsyncpa [#allocation3], 0 }
   0x3   :  { %22 = vsyncpa [#allocation6], 0 }
   0x4   :  { %23 = vsyncpa [#allocation9], 0 }
   0x5   :  { %24 = vsyncpa [#allocation12], 0 }
   0x6   :  { %25 = vsyncpa [#allocation15], 0 }
   0x7   :  { %26 = vsyncpa [#allocation4], 0 }
   0x8   :  { %27 = vsyncpa [#allocation18], 0  ;;  %s1440_s18 = smov [#allocation5]   ;;  %s1206_s22 = scalar_lea.hbm %s1765_s1, 256 }
   0x9   :  { %s45_s19 = sshll.u32 %s1440_s18, 4  ;;  %p1207_p0 = scmp.ne.s32.totalorder %s1765_s1, %s1206_s22  ;;  %s46_s19 = int_to_ptr.vmem [resolvable:$true] %s45_s19 }
   0xa   :  { %p1210_p1 = scmp.lt.u32.totalorder %s1206_s22, %s1765_s1 }
   0xc   :  { %p1212_p2 = pnand %p1210_p1, %p1207_p0 }
   0xe   :  { %1215 = shalt.err (!%p1212_p2)
}
   0xf   :  { %s1216_s27 = scalar_lea.vmem %s46_s19, 256  ;;  %p1221_p4 = scmp.lt.s32.totalorder %s46_s19, %s46_s19 }
  0x10   :  { %p1217_p3 = scmp.ne.s32.totalorder %s46_s19, %s1216_s27  ;;  %p1222_p5 = scmp.lt.s32.totalorder %s1216_s27, %s1216_s27 }
  0x12   :  { %p1223_p6 = por %p1222_p5, %p1221_p4 }
  0x14   :  { %p1224_p7 = pnand %p1223_p6, %p1217_p3 }
  0x16   :  { %1227 = shalt.err (!%p1224_p7)
}
  0x17   :  { %s1441_s28 = smov 128   ;;  %s1442_s29 = smov 8  }
  0x18   :  { %51 = dma.hbm_to_vmem [thread:$0]  %s1765_s1, 256, %s46_s19, [#allocation6], %s1441_s28, %s1441_s28, %s1442_s29  }
  0x19   :  { %s1443_s17 = smov [#allocation8]   ;;  %s1444_s20 = smov [#allocation11]  }
  0x1a   :  { %s71_s18 = sshll.u32 %s1443_s17, 4  ;;  %s99_s21 = sshll.u32 %s1444_s20, 4  ;;  %s72_s18 = int_to_ptr.vmem [resolvable:$true] %s71_s18  ;;  %s100_s21 = int_to_ptr.vmem [resolvable:$true] %s99_s21 }
  0x1b   :  { %s1228_s24 = scalar_lea.hbm %s1768_s4, 1024 }
  0x1c   :  { %p1229_p8 = scmp.ne.s32.totalorder %s1768_s4, %s1228_s24  ;;  %p1232_p9 = scmp.lt.u32.totalorder %s1228_s24, %s1768_s4 }
  0x1e   :  { %p1234_p10 = pnand %p1232_p9, %p1229_p8 }
  0x20   :  { %1237 = shalt.err (!%p1234_p10)
}
  0x21   :  { %s1238_s1 = scalar_lea.vmem %s72_s18, 1024  ;;  %p1243_p12 = scmp.lt.s32.totalorder %s72_s18, %s72_s18 }
  0x22   :  { %p1239_p11 = scmp.ne.s32.totalorder %s72_s18, %s1238_s1  ;;  %p1244_p13 = scmp.lt.s32.totalorder %s1238_s1, %s1238_s1 }
  0x24   :  { %p1245_p0 = por %p1244_p13, %p1243_p12 }
  0x26   :  { %p1246_p1 = pnand %p1245_p0, %p1239_p11 }
  0x28   :  { %1249 = shalt.err (!%p1246_p1)
}
  0x29   :  { %s1445_s19 = smov 64   ;;  %s1446_s30 = smov 4  }
  0x2a   :  { %77 = dma.hbm_to_vmem [thread:$0]  %s1768_s4, 1024, %s72_s18, [#allocation9], %s1445_s19, %s1445_s19, %s1446_s30  }
  0x2b   :  { %s1250_s22 = scalar_lea.hbm %s1772_s8, 1024 }
  0x2c   :  { %p1251_p2 = scmp.ne.s32.totalorder %s1772_s8, %s1250_s22  ;;  %p1254_p3 = scmp.lt.u32.totalorder %s1250_s22, %s1772_s8 }
  0x2e   :  { %p1256_p4 = pnand %p1254_p3, %p1251_p2 }
  0x30   :  { %1259 = shalt.err (!%p1256_p4)
}
  0x31   :  { %s1260_s27 = scalar_lea.vmem %s100_s21, 1024  ;;  %p1265_p6 = scmp.lt.s32.totalorder %s100_s21, %s100_s21 }
  0x32   :  { %p1261_p5 = scmp.ne.s32.totalorder %s100_s21, %s1260_s27  ;;  %p1266_p7 = scmp.lt.s32.totalorder %s1260_s27, %s1260_s27 }
  0x34   :  { %p1267_p8 = por %p1266_p7, %p1265_p6 }
  0x36   :  { %p1268_p9 = pnand %p1267_p8, %p1261_p5 }
  0x38   :  { %1271 = shalt.err (!%p1268_p9)
}
  0x39   :  { %105 = dma.hbm_to_vmem [thread:$0]  %s1772_s8, 1024, %s100_s21, [#allocation12], %s1445_s19, %s1445_s19, %s1446_s30  }
  0x3a   :  { %s1447_s1 = smov [#allocation2]   ;;  %s1448_s17 = smov [#allocation7]  }
  0x3b   :  { %s33_s16 = sshll.u32 %s1447_s1, 4  ;;  %s57_s14 = sshll.u32 %s1448_s17, 4  ;;  %s34_s16 = int_to_ptr.vmem [resolvable:$true] %s33_s16  ;;  %s58_s14 = int_to_ptr.vmem [resolvable:$true] %s57_s14 }
  0x3c   :  { %s1272_s23 = scalar_lea.hbm %s1764_s0, 256 }
  0x3d   :  { %p1273_p10 = scmp.ne.s32.totalorder %s1764_s0, %s1272_s23  ;;  %p1276_p11 = scmp.lt.u32.totalorder %s1272_s23, %s1764_s0 }
  0x3f   :  { %p1278_p12 = pnand %p1276_p11, %p1273_p10 }
  0x41   :  { %1281 = shalt.err (!%p1278_p12)
}
  0x42   :  { %s1282_s8 = scalar_lea.vmem %s34_s16, 256  ;;  %p1287_p0 = scmp.lt.s32.totalorder %s34_s16, %s34_s16 }
  0x43   :  { %p1283_p13 = scmp.ne.s32.totalorder %s34_s16, %s1282_s8  ;;  %p1288_p1 = scmp.lt.s32.totalorder %s1282_s8, %s1282_s8 }
  0x45   :  { %p1289_p2 = por %p1288_p1, %p1287_p0 }
  0x47   :  { %p1290_p3 = pnand %p1289_p2, %p1283_p13 }
  0x49   :  { %1293 = shalt.err (!%p1290_p3)
}
  0x4a   :  { %39 = dma.hbm_to_vmem [thread:$0]  %s1764_s0, 256, %s34_s16, [#allocation3], %s1441_s28, %s1441_s28, %s1442_s29  }
  0x4b   :  { %s1294_s17 = scalar_lea.hbm %s1766_s2, 1024 }
  0x4c   :  { %p1295_p4 = scmp.ne.s32.totalorder %s1766_s2, %s1294_s17  ;;  %p1298_p5 = scmp.lt.u32.totalorder %s1294_s17, %s1766_s2 }
  0x4e   :  { %p1300_p6 = pnand %p1298_p5, %p1295_p4 }
  0x50   :  { %1303 = shalt.err (!%p1300_p6)
}
  0x51   :  { %s1304_s25 = scalar_lea.vmem %s58_s14, 1024  ;;  %p1309_p8 = scmp.lt.s32.totalorder %s58_s14, %s58_s14 }
  0x52   :  { %p1305_p7 = scmp.ne.s32.totalorder %s58_s14, %s1304_s25  ;;  %p1310_p9 = scmp.lt.s32.totalorder %s1304_s25, %s1304_s25 }
  0x54   :  { %p1311_p10 = por %p1310_p9, %p1309_p8 }
  0x56   :  { %p1312_p11 = pnand %p1311_p10, %p1305_p7 }
  0x58   :  { %1315 = shalt.err (!%p1312_p11)
}
  0x59   :  { %63 = dma.hbm_to_vmem [thread:$0]  %s1766_s2, 1024, %s58_s14, [#allocation6], %s1445_s19, %s1445_s19, %s1446_s30  }
  0x5a   :  { %s1449_s26 = smov [#allocation10]   ;;  %s1450_s8 = smov [#allocation13]  }
  0x5b   :  { %s85_s27 = sshll.u32 %s1449_s26, 4  ;;  %s113_s21 = sshll.u32 %s1450_s8, 4  ;;  %s86_s27 = int_to_ptr.vmem [resolvable:$true] %s85_s27  ;;  %s114_s21 = int_to_ptr.vmem [resolvable:$true] %s113_s21 }
  0x5c   :  { %s1316_s1 = scalar_lea.hbm %s1770_s6, 1024 }
  0x5d   :  { %p1317_p12 = scmp.ne.s32.totalorder %s1770_s6, %s1316_s1  ;;  %p1320_p13 = scmp.lt.u32.totalorder %s1316_s1, %s1770_s6 }
  0x5f   :  { %p1322_p0 = pnand %p1320_p13, %p1317_p12 }
  0x61   :  { %1325 = shalt.err (!%p1322_p0)
}
  0x62   :  { %s1326_s2 = scalar_lea.vmem %s86_s27, 1024  ;;  %p1331_p2 = scmp.lt.s32.totalorder %s86_s27, %s86_s27 }
  0x63   :  { %p1327_p1 = scmp.ne.s32.totalorder %s86_s27, %s1326_s2  ;;  %p1332_p3 = scmp.lt.s32.totalorder %s1326_s2, %s1326_s2 }
  0x65   :  { %p1333_p4 = por %p1332_p3, %p1331_p2 }
  0x67   :  { %p1334_p5 = pnand %p1333_p4, %p1327_p1 }
  0x69   :  { %1337 = shalt.err (!%p1334_p5)
}
  0x6a   :  { %91 = dma.hbm_to_vmem [thread:$0]  %s1770_s6, 1024, %s86_s27, [#allocation9], %s1445_s19, %s1445_s19, %s1446_s30  }
  0x6b   :  { %s1338_s16 = scalar_lea.hbm %s1774_s10, 1024 }
  0x6c   :  { %p1339_p6 = scmp.ne.s32.totalorder %s1774_s10, %s1338_s16  ;;  %p1342_p7 = scmp.lt.u32.totalorder %s1338_s16, %s1774_s10 }
  0x6e   :  { %p1344_p8 = pnand %p1342_p7, %p1339_p6 }
  0x70   :  { %1347 = shalt.err (!%p1344_p8)
}
  0x71   :  { %s1348_s1 = scalar_lea.vmem %s114_s21, 1024  ;;  %p1353_p10 = scmp.lt.s32.totalorder %s114_s21, %s114_s21 }
  0x72   :  { %p1349_p9 = scmp.ne.s32.totalorder %s114_s21, %s1348_s1  ;;  %p1354_p11 = scmp.lt.s32.totalorder %s1348_s1, %s1348_s1 }
  0x74   :  { %p1355_p12 = por %p1354_p11, %p1353_p10 }
  0x76   :  { %p1356_p13 = pnand %p1355_p12, %p1349_p9 }
  0x78   :  { %1359 = shalt.err (!%p1356_p13)
}
  0x79   :  { %119 = dma.hbm_to_vmem [thread:$0]  %s1774_s10, 1024, %s114_s21, [#allocation12], %s1445_s19, %s1445_s19, %s1446_s30  }
  0x7a   :  { %s1451_s17 = smov [#allocation14]   ;;  %s1360_s2 = scalar_lea.hbm %s1776_s12, 1024 }
  0x7b   :  { %s127_s20 = sshll.u32 %s1451_s17, 4  ;;  %p1361_p0 = scmp.ne.s32.totalorder %s1776_s12, %s1360_s2  ;;  %s128_s20 = int_to_ptr.vmem [resolvable:$true] %s127_s20 }
  0x7c   :  { %p1364_p1 = scmp.lt.u32.totalorder %s1360_s2, %s1776_s12 }
  0x7e   :  { %p1366_p2 = pnand %p1364_p1, %p1361_p0 }
  0x80   :  { %1369 = shalt.err (!%p1366_p2)
}
  0x81   :  { %s1370_s16 = scalar_lea.vmem %s128_s20, 1024  ;;  %p1375_p4 = scmp.lt.s32.totalorder %s128_s20, %s128_s20 }
  0x82   :  { %p1371_p3 = scmp.ne.s32.totalorder %s128_s20, %s1370_s16  ;;  %p1376_p5 = scmp.lt.s32.totalorder %s1370_s16, %s1370_s16 }
  0x84   :  { %p1377_p6 = por %p1376_p5, %p1375_p4 }
  0x86   :  { %p1378_p7 = pnand %p1377_p6, %p1371_p3 }
  0x88   :  { %1381 = shalt.err (!%p1378_p7)
}
  0x89   :  { %133 = dma.hbm_to_vmem [thread:$0]  %s1776_s12, 1024, %s128_s20, [#allocation15], %s1445_s19, %s1445_s19, %s1446_s30  }
  0x8a   :  { %1426 = dma.done.wait [#allocation3], 256  }
  0x8b   :  { %1427 = vsyncadd [#allocation3], 4294967040 }
  0x8c   :  { %1428 = dma.done.wait [#allocation6], 1280  }
  0x8d   :  { %1429 = vsyncadd [#allocation6], 4294966016 }
  0x8e   :  { %1430 = dma.done.wait [#allocation9], 2048  }
  0x8f   :  { %1431 = vsyncadd [#allocation9], 4294965248 }
  0x90   :  { %1432 = dma.done.wait [#allocation12], 2048  }
  0x91   :  { %1433 = vsyncadd [#allocation12], 4294965248 }
  0x92   :  { %1434 = dma.done.wait [#allocation15], 1024  }
  0x93   :  { %1435 = vsyncadd [#allocation15], 4294966272  ;;  %v1452_v0 = vmov 0.0   ;;  %vm1453_vm0 = vmmov 0   ;;  %v1150_v1 = vld [vmem:[#allocation7] sm:$0xff]   ;;  %v1151_v2 = vld [vmem:[#allocation7 + $0x8] sm:$0xff]  }
  0x94   :  { %1014 = vmatprep.subr.bf16.mxu0 %v1452_v0  ;;  %1030 = vmatprep.mubr.msk.bf16.mxu0 %vm1453_vm0, %v1452_v0  ;;  %v1152_v3 = vld [vmem:[#allocation7 + $0x10] sm:$0xff]   ;;  %v1158_v4 = vld [vmem:[#allocation8] sm:$0xff]   ;;  %v1153_v5 = vld [vmem:[#allocation7 + $0x18] sm:$0xff]  }
  0x95   :  { %1034 = vmatprep.subr.bf16.mxu1 %v1452_v0  ;;  %1050 = vmatprep.mubr.msk.bf16.mxu1 %vm1453_vm0, %v1452_v0  ;;  %v1159_v6 = vld [vmem:[#allocation8 + $0x8] sm:$0xff]   ;;  %v1154_v7 = vld [vmem:[#allocation7 + $0x20] sm:$0xff]   ;;  %v1160_v8 = vld [vmem:[#allocation8 + $0x10] sm:$0xff]  }
  0x96   :  { %1015 = vmatpush3.bf16.msra.mxu0 %v1150_v1  ;;  %1035 = vmatpush3.bf16.msra.mxu1 %v1158_v4  ;;  %v1155_v9 = vld [vmem:[#allocation7 + $0x28] sm:$0xff]   ;;  %v1161_v10 = vld [vmem:[#allocation8 + $0x18] sm:$0xff]   ;;  %v1156_v11 = vld [vmem:[#allocation7 + $0x30] sm:$0xff]  }
  0x97   :  { %1016 = vmatprep.subr.bf16.mxu0 %v1452_v0  ;;  %1036 = vmatprep.subr.bf16.mxu1 %v1452_v0  ;;  %v1162_v12 = vld [vmem:[#allocation8 + $0x20] sm:$0xff]   ;;  %v1157_v13 = vld [vmem:[#allocation7 + $0x38] sm:$0xff]   ;;  %v162_v15 = vld [vmem:[#allocation2 + $0x8] sm:$0xff] }
  0x98   :  { %v161_v14 = vld [vmem:[#allocation2] sm:$0xff]  ;;  %v1163_v16 = vld [vmem:[#allocation8 + $0x28] sm:$0xff]   ;;  %v1164_v18 = vld [vmem:[#allocation8 + $0x30] sm:$0xff]  }
  0x99   :  { %v163_v17 = vpack.c.bf16 %v162_v15, %v161_v14  ;;  %v1165_v19 = vld [vmem:[#allocation8 + $0x38] sm:$0xff]   ;;  %v1174_v20 = vld [vmem:[#allocation10] sm:$0xff]   ;;  %v1175_v21 = vld [vmem:[#allocation10 + $0x8] sm:$0xff]  }
  0x9a   :  { %1017 = vmatpush3.bf16.msra.mxu0 %v1151_v2  ;;  %1037 = vmatpush3.bf16.msra.mxu1 %v1159_v6  ;;  %v1176_v22 = vld [vmem:[#allocation10 + $0x10] sm:$0xff]   ;;  %v1177_v23 = vld [vmem:[#allocation10 + $0x18] sm:$0xff]   ;;  %v1178_v24 = vld [vmem:[#allocation10 + $0x20] sm:$0xff]  }
  0x9b   :  { %1018 = vmatprep.subr.bf16.mxu0 %v1452_v0  ;;  %1038 = vmatprep.subr.bf16.mxu1 %v1452_v0  ;;  %v1179_v25 = vld [vmem:[#allocation10 + $0x28] sm:$0xff]   ;;  %v904_v26 = vld [vmem:[%s1767_s3] ss:$0 sm:$0xff]  ;;  %v1168_v38 = vld [vmem:[#allocation11 + $0x10] sm:$0xff]  }
  0x9c   :  { %v1166_v35 = vld [vmem:[#allocation11] sm:$0xff]   ;;  %v1167_v37 = vld [vmem:[#allocation11 + $0x8] sm:$0xff]   ;;  %v1169_v39 = vld [vmem:[#allocation11 + $0x18] sm:$0xff]  }
  0x9d   :  { %v1170_v40 = vld [vmem:[#allocation11 + $0x20] sm:$0xff]   ;;  %v1171_v41 = vld [vmem:[#allocation11 + $0x28] sm:$0xff]   ;;  %v1172_v42 = vld [vmem:[#allocation11 + $0x30] sm:$0xff]  }
  0x9e   :  { %1019 = vmatpush3.bf16.msra.mxu0 %v1152_v3  ;;  %1039 = vmatpush3.bf16.msra.mxu1 %v1160_v8  ;;  %v1173_v43 = vld [vmem:[#allocation11 + $0x38] sm:$0xff]   ;;  %v508_v44 = vld [vmem:[#allocation5] sm:$0xff]  ;;  %v913_v49 = vld [vmem:[%s1769_s5] ss:$0 sm:$0xff] }
  0x9f   :  { %1020 = vmatprep.subr.bf16.mxu0 %v1452_v0  ;;  %1040 = vmatprep.subr.bf16.mxu1 %v1452_v0  ;;  %v509_v45 = vld [vmem:[#allocation5 + $0x8] sm:$0xff]  ;;  %v1180_v47 = vld [vmem:[#allocation10 + $0x30] sm:$0xff]   ;;  %v1182_v58 = vld [vmem:[#allocation13] sm:$0xff]  }
  0xa0   :  { %v510_v46 = vpack.c.bf16 %v509_v45, %v508_v44  ;;  %v1181_v48 = vld [vmem:[#allocation10 + $0x38] sm:$0xff]   ;;  %v1183_v60 = vld [vmem:[#allocation13 + $0x8] sm:$0xff]   ;;  %v1184_v61 = vld [vmem:[#allocation13 + $0x10] sm:$0xff]  }
  0xa1   :  { %v1185_v62 = vld [vmem:[#allocation13 + $0x18] sm:$0xff]   ;;  %v1186_v63 = vld [vmem:[#allocation13 + $0x20] sm:$0xff]   ;;  %v1187_v1 = vld [vmem:[#allocation13 + $0x28] sm:$0xff]  }
  0xa2   :  { %1021 = vmatpush3.bf16.msra.mxu0 %v1153_v5  ;;  %1041 = vmatpush3.bf16.msra.mxu1 %v1161_v10  ;;  %v931_v2 = vld [vmem:[%s1773_s9] ss:$0 sm:$0xff]  ;;  %v1188_v3 = vld [vmem:[#allocation13 + $0x30] sm:$0xff]   ;;  %v1189_v8 = vld [vmem:[#allocation13 + $0x38] sm:$0xff]  }
  0xa3   :  { %1022 = vmatprep.subr.bf16.mxu0 %v1452_v0  ;;  %1042 = vmatprep.subr.bf16.mxu1 %v1452_v0  ;;  %v1190_v14 = vld [vmem:[#allocation14] sm:$0xff]   ;;  %v1191_v15 = vld [vmem:[#allocation14 + $0x8] sm:$0xff]  }
  0xa6   :  { %1023 = vmatpush3.bf16.msra.mxu0 %v1154_v7  ;;  %1043 = vmatpush3.bf16.msra.mxu1 %v1162_v12 }
  0xa7   :  { %1024 = vmatprep.subr.bf16.mxu0 %v1452_v0  ;;  %1044 = vmatprep.subr.bf16.mxu1 %v1452_v0 }
  0xaa   :  { %1025 = vmatpush3.bf16.msra.mxu0 %v1155_v9  ;;  %1045 = vmatpush3.bf16.msra.mxu1 %v1163_v16  ;;  %v1192_v16 = vld [vmem:[#allocation14 + $0x10] sm:$0xff]  }
  0xab   :  { %1026 = vmatprep.subr.bf16.mxu0 %v1452_v0  ;;  %1046 = vmatprep.subr.bf16.mxu1 %v1452_v0 }
  0xae   :  { %1027 = vmatpush3.bf16.msra.mxu0 %v1156_v11  ;;  %1047 = vmatpush3.bf16.msra.mxu1 %v1164_v18  ;;  %v1194_v18 = vld [vmem:[#allocation14 + $0x20] sm:$0xff]  }
  0xaf   :  { %1028 = vmatprep.subr.bf16.mxu0 %v1452_v0  ;;  %1048 = vmatprep.subr.bf16.mxu1 %v1452_v0 }
  0xb2   :  { %1029 = vmatpush3.bf16.msra.mxu0 %v1157_v13  ;;  %1049 = vmatpush3.bf16.msra.mxu1 %v1165_v19  ;;  %v1195_v19 = vld [vmem:[#allocation14 + $0x28] sm:$0xff]  }
  0xb3   :  { %1054 = vmatprep.subr.bf16.mxu0 %v1452_v0  ;;  %1074 = vmatprep.subr.bf16.mxu1 %v1452_v0 }
  0xb5   :  { %1031 = vmatmul.mubr.bf16.vlgmr.msra.gmra.mrb[0].mxu0 %v163_v17  ;;  %v1193_v17 = vld [vmem:[#allocation14 + $0x18] sm:$0xff]  }
  0xb6   :  { %1070 = vmatprep.mubr.msk.bf16.mxu0 %vm1453_vm0, %v1452_v0  ;;  %1055 = vmatpush3.bf16.msra.mxu0 %v1174_v20  ;;  %v1196_v20 = vld [vmem:[#allocation14 + $0x30] sm:$0xff]  }
  0xb7   :  { %1056 = vmatprep.subr.bf16.mxu0 %v1452_v0 }
  0xba   :  { %1057 = vmatpush3.bf16.msra.mxu0 %v1175_v21  ;;  %v1197_v21 = vld [vmem:[#allocation14 + $0x38] sm:$0xff]  }
  0xbb   :  { %1058 = vmatprep.subr.bf16.mxu0 %v1452_v0 }
  0xbe   :  { %1059 = vmatpush3.bf16.msra.mxu0 %v1176_v22  ;;  %v922_v22 = vld [vmem:[%s1771_s7] ss:$0 sm:$0xff]  ;;  %s1454_s7 = smov [#allocation17]  }
  0xbf   :  { %1060 = vmatprep.subr.bf16.mxu0 %v1452_v0  ;;  %s884_s1 = sshll.u32 %s1454_s7, 4  ;;  %s885_s1 = int_to_ptr.vmem [resolvable:$true] %s884_s1 }
  0xc0   :  { %s1382_s6 = scalar_lea.vmem %s885_s1, 256  ;;  %p1387_p9 = scmp.lt.s32.totalorder %s885_s1, %s885_s1 }
  0xc1   :  { %p1383_p8 = scmp.ne.s32.totalorder %s885_s1, %s1382_s6  ;;  %p1388_p10 = scmp.lt.s32.totalorder %s1382_s6, %s1382_s6 }
  0xc2   :  { %1061 = vmatpush3.bf16.msra.mxu0 %v1177_v23 }
  0xc3   :  { %1062 = vmatprep.subr.bf16.mxu0 %v1452_v0  ;;  %p1389_p11 = por %p1388_p10, %p1387_p9 }
  0xc5   :  { %p1390_p12 = pnand %p1389_p11, %p1383_p8 }
  0xc6   :  { %1063 = vmatpush3.bf16.msra.mxu0 %v1178_v24 }
  0xc7   :  { %1064 = vmatprep.subr.bf16.mxu0 %v1452_v0 }
  0xca   :  { %1065 = vmatpush3.bf16.msra.mxu0 %v1179_v25 }
  0xcb   :  { %1066 = vmatprep.subr.bf16.mxu0 %v1452_v0 }
  0xce   :  { %1067 = vmatpush3.bf16.msra.mxu0 %v1180_v47 }
  0xcf   :  { %1068 = vmatprep.subr.bf16.mxu0 %v1452_v0 }
  0xd2   :  { %1069 = vmatpush3.bf16.msra.mxu0 %v1181_v48 }
  0xd3   :  { %1094 = vmatprep.subr.bf16.mxu0 %v1452_v0 }
 0x188   :  { %v269_v27 = vpop.f32.mrb[0].mxu0 }
 0x189   :  { %v270_v28 = vadd.f32 %v904_v26, %v269_v27  ;;  %v1032_v29 = vpop.f32.mrb[1].mxu0 }
 0x18a   :  { %v272_v30 = vpop.f32.mrb[2].mxu0  ;;  %v940_v29 = vld [vmem:[%s1775_s11] ss:$0 sm:$0xff] }
 0x18b   :  { %v273_v31 = vadd.f32 %v904_v26, %v272_v30  ;;  %v1033_v32 = vpop.f32.mrb[3].mxu0  ;;  %v276_v33 = vmax.f32 %v270_v28, 0.0 }
 0x18d   :  { %v277_v34 = vmax.f32 %v273_v31, 0.0 }
 0x18f   :  { %v278_v36 = vpack.c.bf16 %v277_v34, %v276_v33 }
 0x191   :  { %1051 = vmatmul.mubr.bf16.vlgmr.msra.gmra.mrb[0].mxu1 %v278_v36 }
 0x192   :  { %1075 = vmatpush3.bf16.msra.mxu1 %v1166_v35  ;;  %1090 = vmatprep.mubr.msk.bf16.mxu1 %vm1453_vm0, %v1452_v0 }
 0x193   :  { %1076 = vmatprep.subr.bf16.mxu1 %v1452_v0 }
 0x196   :  { %1077 = vmatpush3.bf16.msra.mxu1 %v1167_v37 }
 0x197   :  { %1078 = vmatprep.subr.bf16.mxu1 %v1452_v0 }
 0x19a   :  { %1079 = vmatpush3.bf16.msra.mxu1 %v1168_v38 }
 0x19b   :  { %1080 = vmatprep.subr.bf16.mxu1 %v1452_v0 }
 0x19e   :  { %1081 = vmatpush3.bf16.msra.mxu1 %v1169_v39 }
 0x19f   :  { %1082 = vmatprep.subr.bf16.mxu1 %v1452_v0 }
 0x1a2   :  { %1083 = vmatpush3.bf16.msra.mxu1 %v1170_v40 }
 0x1a3   :  { %1084 = vmatprep.subr.bf16.mxu1 %v1452_v0 }
 0x1a6   :  { %1085 = vmatpush3.bf16.msra.mxu1 %v1171_v41 }
 0x1a7   :  { %1086 = vmatprep.subr.bf16.mxu1 %v1452_v0 }
 0x1aa   :  { %1087 = vmatpush3.bf16.msra.mxu1 %v1172_v42 }
 0x1ab   :  { %1088 = vmatprep.subr.bf16.mxu1 %v1452_v0 }
 0x1ae   :  { %1089 = vmatpush3.bf16.msra.mxu1 %v1173_v43 }
 0x1af   :  { %1114 = vmatprep.subr.bf16.mxu1 %v1452_v0 }
 0x1b1   :  { %1091 = vmatmul.mubr.bf16.vlgmr.msra.gmra.mrb[4].mxu1 %v510_v46 }
 0x1b2   :  { %1130 = vmatprep.mubr.msk.bf16.mxu1 %vm1453_vm0, %v1452_v0  ;;  %1115 = vmatpush3.bf16.msra.mxu1 %v1190_v14 }
 0x1b3   :  { %1116 = vmatprep.subr.bf16.mxu1 %v1452_v0 }
 0x1b6   :  { %1117 = vmatpush3.bf16.msra.mxu1 %v1191_v15 }
 0x1b7   :  { %1118 = vmatprep.subr.bf16.mxu1 %v1452_v0 }
 0x1ba   :  { %1119 = vmatpush3.bf16.msra.mxu1 %v1192_v16 }
 0x1bb   :  { %1120 = vmatprep.subr.bf16.mxu1 %v1452_v0 }
 0x1be   :  { %1121 = vmatpush3.bf16.msra.mxu1 %v1193_v17 }
 0x1bf   :  { %1122 = vmatprep.subr.bf16.mxu1 %v1452_v0 }
 0x1c2   :  { %1123 = vmatpush3.bf16.msra.mxu1 %v1194_v18 }
 0x1c3   :  { %1124 = vmatprep.subr.bf16.mxu1 %v1452_v0 }
 0x1c6   :  { %1125 = vmatpush3.bf16.msra.mxu1 %v1195_v19 }
 0x1c7   :  { %1126 = vmatprep.subr.bf16.mxu1 %v1452_v0 }
 0x1ca   :  { %1127 = vmatpush3.bf16.msra.mxu1 %v1196_v20 }
 0x1cb   :  { %1128 = vmatprep.subr.bf16.mxu1 %v1452_v0 }
 0x1ce   :  { %1129 = vmatpush3.bf16.msra.mxu1 %v1197_v21 }
 0x264   :  { %v384_v50 = vpop.f32.mrb[0].mxu1 }
 0x265   :  { %v385_v51 = vadd.f32 %v913_v49, %v384_v50  ;;  %v1052_v52 = vpop.f32.mrb[1].mxu1 }
 0x266   :  { %v387_v53 = vpop.f32.mrb[2].mxu1 }
 0x267   :  { %v388_v54 = vadd.f32 %v913_v49, %v387_v53  ;;  %v1053_v55 = vpop.f32.mrb[3].mxu1  ;;  %v391_v56 = vmax.f32 %v385_v51, 0.0 }
 0x269   :  { %v392_v57 = vmax.f32 %v388_v54, 0.0 }
 0x26b   :  { %v393_v59 = vpack.c.bf16 %v392_v57, %v391_v56 }
 0x26d   :  { %1071 = vmatmul.mubr.bf16.vlgmr.msra.gmra.mrb[4].mxu0 %v393_v59 }
 0x26e   :  { %1095 = vmatpush3.bf16.msra.mxu0 %v1182_v58  ;;  %1110 = vmatprep.mubr.msk.bf16.mxu0 %vm1453_vm0, %v1452_v0 }
 0x26f   :  { %1096 = vmatprep.subr.bf16.mxu0 %v1452_v0 }
 0x272   :  { %1097 = vmatpush3.bf16.msra.mxu0 %v1183_v60 }
 0x273   :  { %1098 = vmatprep.subr.bf16.mxu0 %v1452_v0 }
 0x276   :  { %1099 = vmatpush3.bf16.msra.mxu0 %v1184_v61 }
 0x277   :  { %1100 = vmatprep.subr.bf16.mxu0 %v1452_v0 }
 0x27a   :  { %1101 = vmatpush3.bf16.msra.mxu0 %v1185_v62 }
 0x27b   :  { %1102 = vmatprep.subr.bf16.mxu0 %v1452_v0 }
 0x27e   :  { %1103 = vmatpush3.bf16.msra.mxu0 %v1186_v63 }
 0x27f   :  { %1104 = vmatprep.subr.bf16.mxu0 %v1452_v0 }
 0x282   :  { %1105 = vmatpush3.bf16.msra.mxu0 %v1187_v1 }
 0x283   :  { %1106 = vmatprep.subr.bf16.mxu0 %v1452_v0 }
 0x284   :  { %v616_v4 = vpop.f32.mrb[4].mxu1 }
 0x285   :  { %v617_v5 = vadd.f32 %v931_v2, %v616_v4  ;;  %v1092_v6 = vpop.f32.mrb[5].mxu1 }
 0x286   :  { %v619_v7 = vpop.f32.mrb[6].mxu1  ;;  %1107 = vmatpush3.bf16.msra.mxu0 %v1188_v3 }
 0x287   :  { %v620_v9 = vadd.f32 %v931_v2, %v619_v7  ;;  %v1093_v10 = vpop.f32.mrb[7].mxu1  ;;  %1108 = vmatprep.subr.bf16.mxu0 %v1452_v0  ;;  %v623_v11 = vmax.f32 %v617_v5, 0.0 }
 0x289   :  { %v624_v12 = vmax.f32 %v620_v9, 0.0 }
 0x28a   :  { %1109 = vmatpush3.bf16.msra.mxu0 %v1189_v8 }
 0x28b   :  { %v625_v13 = vpack.c.bf16 %v624_v12, %v623_v11 }
 0x28d   :  { %1111 = vmatmul.mubr.bf16.vlgmr.msra.gmra.mrb[8].mxu0 %v625_v13 }
 0x340   :  { %v499_v23 = vpop.f32.mrb[4].mxu0 }
 0x341   :  { %v500_v24 = vadd.f32 %v922_v22, %v499_v23  ;;  %v1072_v25 = vpop.f32.mrb[5].mxu0 }
 0x342   :  { %v502_v26 = vpop.f32.mrb[6].mxu0 }
 0x343   :  { %506 = vst [vmem:[#allocation17] sm:$0xff] %v500_v24  ;;  %v503_v27 = vadd.f32 %v922_v22, %v502_v26  ;;  %v1073_v28 = vpop.f32.mrb[7].mxu0 }
 0x345   :  { %507 = vst [vmem:[#allocation17 + $0x8] sm:$0xff] %v503_v27 }
 0x360   :  { %v731_v30 = vpop.f32.mrb[8].mxu0 }
 0x361   :  { %v732_v0 = vadd.f32 %v940_v29, %v731_v30  ;;  %v1112_v31 = vpop.f32.mrb[9].mxu0 }
 0x362   :  { %v734_v32 = vpop.f32.mrb[10].mxu0 }
 0x363   :  { %v735_v33 = vadd.f32 %v940_v29, %v734_v32  ;;  %v1113_v34 = vpop.f32.mrb[11].mxu0  ;;  %v738_v35 = vmax.f32 %v732_v0, 0.0 }
 0x365   :  { %v739_v36 = vmax.f32 %v735_v33, 0.0 }
 0x367   :  { %v740_v37 = vpack.c.bf16 %v739_v36, %v738_v35 }
 0x369   :  { %1131 = vmatmul.mubr.bf16.vlgmr.msra.gmra.mrb[8].mxu1 %v740_v37 }
 0x36a   :  { %1393 = shalt.err (!%p1390_p12)
}
 0x36b   :  { %s1394_s17 = scalar_lea.hbm %s1779_s15, 256 }
 0x36c   :  { %p1395_p13 = scmp.ne.s32.totalorder %s1779_s15, %s1394_s17  ;;  %p1398_p0 = scmp.lt.u32.totalorder %s1394_s17, %s1779_s15 }
 0x36e   :  { %p1400_p1 = pnand %p1398_p0, %p1395_p13 }
 0x370   :  { %1403 = shalt.err (!%p1400_p1)
}
 0x371   :  { %890 = dma.vmem_to_hbm [thread:$0]  %s885_s1, 256, %s1779_s15, [#allocation18], %s1441_s28, %s1441_s28, %s1442_s29  }
 0x372   :  { %v949_v38 = vld [vmem:[%s1777_s13] ss:$0 sm:$0xff]  ;;  %s1455_s15 = smov [#allocation16]  }
 0x373   :  { %s872_s16 = sshll.u32 %s1455_s15, 4  ;;  %s873_s16 = int_to_ptr.vmem [resolvable:$true] %s872_s16 }
 0x374   :  { %s1404_s13 = scalar_lea.vmem %s873_s16, 256  ;;  %p1409_p3 = scmp.lt.s32.totalorder %s873_s16, %s873_s16 }
 0x375   :  { %p1405_p2 = scmp.ne.s32.totalorder %s873_s16, %s1404_s13  ;;  %p1410_p4 = scmp.lt.s32.totalorder %s1404_s13, %s1404_s13 }
 0x377   :  { %p1411_p5 = por %p1410_p4, %p1409_p3 }
 0x379   :  { %p1412_p6 = pnand %p1411_p5, %p1405_p2 }
 0x43c   :  { %v846_v39 = vpop.f32.mrb[8].mxu1 }
 0x43d   :  { %v847_v40 = vadd.f32 %v949_v38, %v846_v39  ;;  %v1132_v41 = vpop.f32.mrb[9].mxu1 }
 0x43e   :  { %v849_v42 = vpop.f32.mrb[10].mxu1 }
 0x43f   :  { %v958_v43 = vmul.f32 -1.442695, %v847_v40  ;;  %v850_v44 = vadd.f32 %v949_v38, %v849_v42  ;;  %v1133_v45 = vpop.f32.mrb[11].mxu1 }
 0x441   :  { %1198 = vpow2.f32 %v958_v43  ;;  %v959_v46 = vmul.f32 -1.442695, %v850_v44 }
 0x443   :  { %1200 = vpow2.f32 %v959_v46 }
 0x44b   :  { %v1199_v47 = vpop.eup %1198 }
 0x44c   :  { %v859_v48 = vadd.f32 1.0, %v1199_v47 }
 0x44d   :  { %v1201_v49 = vpop.eup %1200 }
 0x44e   :  { %1202 = vrcp.f32 %v859_v48  ;;  %v860_v50 = vadd.f32 1.0, %v1201_v49 }
 0x450   :  { %1204 = vrcp.f32 %v860_v50 }
 0x458   :  { %v1203_v51 = vpop.eup %1202 }
 0x459   :  { %865 = vst [vmem:[#allocation16] sm:$0xff] %v1203_v51 }
 0x45a   :  { %v1205_v52 = vpop.eup %1204 }
 0x45b   :  { %866 = vst [vmem:[#allocation16 + $0x8] sm:$0xff] %v1205_v52 }
 0x45c   :  { %1415 = shalt.err (!%p1412_p6)
}
 0x45d   :  { %s1782_s12 = sld [smem:[#allocation26_spill]] }
 0x463   :  { %s1416_s19 = scalar_lea.hbm %s1782_s12, 256 }
 0x464   :  { %p1417_p7 = scmp.ne.s32.totalorder %s1782_s12, %s1416_s19  ;;  %p1420_p8 = scmp.lt.u32.totalorder %s1416_s19, %s1782_s12 }
 0x466   :  { %p1422_p9 = pnand %p1420_p8, %p1417_p7 }
 0x468   :  { %1425 = shalt.err (!%p1422_p9)
}
 0x469   :  { %878 = dma.vmem_to_hbm [thread:$0]  %s873_s16, 256, %s1782_s12, [#allocation4], %s1441_s28, %s1441_s28, %s1442_s29  }
 0x46a   :  { %1436 = dma.done.wait [#allocation4], 256  }
 0x46b   :  { %1437 = vsyncadd [#allocation4], 4294967040 }
 0x46c   :  { %1438 = dma.done.wait [#allocation18], 256  }
 0x46d   :  { %1439 = vsyncadd [#allocation18], 4294967040 }
 0x46e   :  { %897 = vsyncpa [#allocation3], 1 }
 0x46f   :  { %898 = vsyncpa [#allocation6], 1 }
 0x470   :  { %899 = vsyncpa [#allocation9], 1 }
 0x471   :  { %900 = vsyncpa [#allocation12], 1 }
 0x472   :  { %901 = vsyncpa [#allocation15], 1 }
 0x473   :  { %902 = vsyncpa [#allocation4], 1 }
 0x474   :  { %903 = vsyncpa [#allocation18], 1 }

</bundles_post_ra>
